<compile_context>
chip_gen: v7x
topology: tpu7x:2x2x1
jax: 0.10.0
libtpu: 0.0.40
codegen_flags: <defaults>
</compile_context>

<pallas_src>
import functools

import jax
import jax.numpy as jnp
from jax import lax
from jax.experimental import pallas as pl
from jax.experimental.pallas import tpu as pltpu


def _round_up(x, m):
    return (x + m - 1) // m * m


def _sublane_multiple(itemsize):
    # dtype-native sublane packing: f32 -> 8, bf16 -> 16, int8/fp8 -> 32.
    return {4: 8, 2: 16, 1: 32}.get(itemsize, 8)


def _vmem_budget_bytes():
    # ~75% of physical VMEM, capped at 96 MiB:
    #   v5e/v6e: 128 MiB physical -> 96 MiB budget
    #   v7x:      64 MiB physical -> 48 MiB budget
    try:
        phys = int(pltpu.get_tpu_info().vmem_capacity_bytes)
    except Exception:  # conservative fallback (v7x-sized)
        phys = 64 << 20
    return int(min(phys * 3 // 4, 96 << 20))


def _apply_activation(acc, activation):
    if activation is None:
        return acc
    if activation == "relu":
        return jnp.maximum(acc, 0.0)
    if activation == "tanh":
        return jnp.tanh(acc)
    assert callable(activation)
    return activation(acc)


def _matmul_nk(x_tile, w_tile, precision):
    # x_tile: [tm, tk], w_tile: [tn, tk] (native torch [out, in] layout).
    # Contract the last dim of both operands -> no materialized transpose.
    # TODO(synk): if a bundle dump shows Mosaic emitting per-tile vxpose for
    # this transposed-RHS contraction, cache a [K, N] weight copy instead.
    return lax.dot_general(
        x_tile,
        w_tile,
        dimension_numbers=(((1,), (1,)), ((), ())),
        preferred_element_type=jnp.float32,
        precision=precision,
    )


# ------------------------------- kernels ------------------------------------


def _mlp_noacc_kernel(*refs, use_bias, activation, precision):
    """Single-K-step kernel (weight-resident and grid_k == 1 tiled paths)."""
    if use_bias:
        x_ref, w_ref, b_ref, o_ref = refs
    else:
        x_ref, w_ref, o_ref = refs
        b_ref = None
    acc = _matmul_nk(x_ref[...], w_ref[...], precision)
    if use_bias:
        acc = acc + b_ref[...]  # (1, tn) broadcasts over rows
    o_ref[...] = _apply_activation(acc, activation).astype(o_ref.dtype)


def _mlp_acc_kernel(*refs, use_bias, activation, precision):
    """3-D grid kernel with an f32 VMEM accumulator over the K axis."""
    if use_bias:
        x_ref, w_ref, b_ref, o_ref, acc_ref = refs
    else:
        x_ref, w_ref, o_ref, acc_ref = refs
        b_ref = None

    k = pl.program_id(2)

    @pl.when(k == 0)
    def _():
        acc_ref[...] = jnp.zeros_like(acc_ref)

    acc_ref[...] += _matmul_nk(x_ref[...], w_ref[...], precision)

    @pl.when(k == pl.num_programs(2) - 1)
    def _():
        acc = acc_ref[...]
        if use_bias:
            acc = acc + b_ref[...]
        o_ref[...] = _apply_activation(acc, activation).astype(o_ref.dtype)


# ------------------------------- wrapper ------------------------------------


def nonlinear_mlp(x, weight, bias=None, activation=None):
    """Pallas equivalent of NonlinearMLP.forward.

    x:          [..., in_feature]
    weight:     [out_feature, in_feature]  (torch nn.Linear convention)
    bias:       [out_feature] or None
    activation: None | "relu" | "tanh" | jnp-traceable callable
    """
    in_feature = x.shape[-1]
    out_feature, w_in = weight.shape
    assert w_in == in_feature
    lead_shape = x.shape[:-1]
    use_bias = bias is not None

    x2d = x.reshape(-1, in_feature)  # [M, K]
    M, K = x2d.shape
    N = out_feature

    itemsize = jnp.dtype(x.dtype).itemsize
    sub = _sublane_multiple(itemsize)
    budget = _vmem_budget_bytes()

    # fp32 operands: full-precision MXU passes so numerics match torch fp32.
    precision = (
        lax.Precision.HIGHEST
        if x.dtype == jnp.float32 and weight.dtype == jnp.float32
        else None
    )

    b2d = bias.reshape(1, N) if use_bias else None
    w_bytes = N * K * itemsize + (N * itemsize if use_bias else 0)

    tm = min(512, _round_up(M, sub))

    # ---- path selection -----------------------------------------------------
    resident = (
        w_bytes <= (4 << 20)
        and 2 * tm * K * itemsize + w_bytes + 2 * tm * N * itemsize <= budget // 2
    )

    if resident:
        # Weight (and bias) DMA'd once and kept resident in VMEM; only x and
        # the output stream.  No padding at all.
        grid_m = pl.cdiv(M, tm)
        if grid_m == 1 and M > sub:  # keep both v7x TensorCores busy
            tm = _round_up(pl.cdiv(M, 2), sub)
            grid_m = pl.cdiv(M, tm)

        grid = (grid_m,)
        xk, wk = x2d, weight
        in_specs = [
            pl.BlockSpec((tm, K), lambda i: (i, 0)),
            pl.BlockSpec((N, K), lambda i: (0, 0)),  # same block every step
        ]
        bias_spec = pl.BlockSpec((1, N), lambda i: (0, 0))
        out_specs = pl.BlockSpec((tm, N), lambda i: (i, 0))
        scratch_shapes = []
        dims = ("parallel",)
        kernel = functools.partial(
            _mlp_noacc_kernel, use_bias=use_bias, activation=activation,
            precision=precision)
    else:
        # Large tiles sized against the generation-specific VMEM budget.
        tn = min(512, _round_up(N, 128))
        Kp128 = _round_up(K, 128)
        grid_k = pl.cdiv(Kp128, 2048)                # aim for <= 2048-wide K steps
        tk = _round_up(pl.cdiv(Kp128, grid_k), 128)  # balanced -> minimal K pad

        def footprint(tm_, tn_, tk_):
            return (
                2 * (tm_ * tk_ + tn_ * tk_) * itemsize      # double-buffered x, W
                + (2 * tn_ * itemsize if use_bias else 0)   # double-buffered bias
                + tm_ * tn_ * 4                             # f32 accumulator
                + 2 * tm_ * tn_ * itemsize                  # double-buffered out
            )

        while footprint(tm, tn, tk) > budget and tk > 256:
            tk = _round_up(tk // 2, 128)
        while footprint(tm, tn, tk) > budget and tn > 256:
            tn //= 2
        while footprint(tm, tn, tk) > budget and tm > 2 * sub:
            tm = _round_up(tm // 2, sub)

        grid_k = pl.cdiv(Kp128, tk)
        grid_m = pl.cdiv(M, tm)
        grid_n = pl.cdiv(N, tn)
        if grid_m * grid_n == 1 and M > sub:  # keep both v7x TensorCores busy
            tm = _round_up(pl.cdiv(M, 2), sub)
            grid_m = pl.cdiv(M, tm)

        if grid_k == 1:
            # Single K step: use the full (unpadded) K extent as the block and
            # skip the accumulator read-modify-write entirely.
            Kp = K
            grid = (grid_m, grid_n)
            in_specs = [
                pl.BlockSpec((tm, K), lambda i, j: (i, 0)),
                pl.BlockSpec((tn, K), lambda i, j: (j, 0)),
            ]
            bias_spec = pl.BlockSpec((1, tn), lambda i, j: (0, j))
            out_specs = pl.BlockSpec((tm, tn), lambda i, j: (i, j))
            scratch_shapes = []
            dims = ("parallel", "parallel")
            kernel = functools.partial(
                _mlp_noacc_kernel, use_bias=use_bias, activation=activation,
                precision=precision)
        else:
            Kp = grid_k * tk
            grid = (grid_m, grid_n, grid_k)
            in_specs = [
                pl.BlockSpec((tm, tk), lambda i, j, k: (i, k)),   # x tile
                pl.BlockSpec((tn, tk), lambda i, j, k: (j, k)),   # [N, K] weight tile
            ]
            bias_spec = pl.BlockSpec((1, tn), lambda i, j, k: (0, j))
            out_specs = pl.BlockSpec((tm, tn), lambda i, j, k: (i, j))
            scratch_shapes = [pltpu.VMEM((tm, tn), jnp.float32)]
            dims = ("parallel", "parallel", "arbitrary")
            kernel = functools.partial(
                _mlp_acc_kernel, use_bias=use_bias, activation=activation,
                precision=precision)

        # Only the contraction axis is zero-padded (zero K columns contribute
        # nothing); M/N stay unpadded -- OOB rows/cols of partial edge tiles
        # only feed output elements that Pallas drops on store.
        xk = x2d if Kp == K else jnp.pad(x2d, ((0, 0), (0, Kp - K)))
        wk = weight if Kp == K else jnp.pad(weight, ((0, 0), (0, Kp - K)))

    operands = [xk, wk]
    if use_bias:
        operands.append(b2d)
        in_specs = in_specs + [bias_spec]

    cost = pl.CostEstimate(
        flops=2 * M * N * K,
        bytes_accessed=(M * K + N * K + (N if use_bias else 0) + M * N) * itemsize,
        transcendentals=M * N if activation == "tanh" else 0,
    )

    out2d = pl.pallas_call(
        kernel,
        out_shape=jax.ShapeDtypeStruct((M, N), x.dtype),
        grid_spec=pltpu.PrefetchScalarGridSpec(
            num_scalar_prefetch=0,
            grid=grid,
            in_specs=in_specs,
            out_specs=out_specs,
            scratch_shapes=scratch_shapes,
        ),
        compiler_params=pltpu.CompilerParams(
            dimension_semantics=dims,
            vmem_limit_bytes=budget,
        ),
        cost_estimate=cost,
    )(*operands)

    return out2d.reshape(*lead_shape, out_feature)


# --------------------------------- test --------------------------------------


def _ref_mlp(x, w, b=None, act=None):
    y = jnp.einsum("...k,nk->...n", x, w, precision=lax.Precision.HIGHEST)
    if b is not None:
        y = y + b
    if act == "relu":
        y = jnp.maximum(y, 0.0)
    elif act == "tanh":
        y = jnp.tanh(y)
    return y


if __name__ == "__main__":
    key = jax.random.PRNGKey(0)
    k_x, k_w, k_x2, k_w2, k_b2 = jax.random.split(key, 5)

    # --- small config (weight-resident path), module defaults -----------------
    batch, seq, in_feature, out_feature = 2, 8, 32, 64
    x = jax.random.normal(k_x, (batch, seq, in_feature), dtype=jnp.float32)
    # reset_parameters: orthogonal_ weight, zeros_ bias
    weight = jax.nn.initializers.orthogonal()(k_w, (out_feature, in_feature), jnp.float32)
    bias = jnp.zeros((out_feature,), jnp.float32)

    # 1) activation=None (identity), bias=True  -- the module defaults.
    out = jax.block_until_ready(nonlinear_mlp(x, weight, bias=bias, activation=None))
    assert out.shape == (batch, seq, out_feature)
    assert jnp.allclose(out, _ref_mlp(x, weight, bias), atol=1e-5, rtol=1e-5)

    # 2) tanh activation with bias.
    out_t = jax.block_until_ready(nonlinear_mlp(x, weight, bias=bias, activation="tanh"))
    assert jnp.allclose(out_t, _ref_mlp(x, weight, bias, "tanh"), atol=1e-5, rtol=1e-5)

    # 3) relu activation, no bias (bias operand dropped entirely).
    out_r = jax.block_until_ready(nonlinear_mlp(x, weight, bias=None, activation="relu"))
    assert jnp.allclose(out_r, _ref_mlp(x, weight, None, "relu"), atol=1e-5, rtol=1e-5)

    # --- moderate config to exercise the tiled (non-resident) path ------------
    b2s, s2, in2, out2 = 2, 136, 1024, 1152
    x2 = jax.random.normal(k_x2, (b2s, s2, in2), dtype=jnp.float32)
    w2 = jax.random.normal(k_w2, (out2, in2), dtype=jnp.float32) * 0.03
    b2 = jax.random.normal(k_b2, (out2,), dtype=jnp.float32) * 0.1
    out_big = jax.block_until_ready(nonlinear_mlp(x2, w2, bias=b2, activation="relu"))
    assert out_big.shape == (b2s, s2, out2)
    assert jnp.allclose(out_big, _ref_mlp(x2, w2, b2, "relu"), atol=1e-4, rtol=1e-4)

    print("KERNEL_OK")
</pallas_src>

<mosaic_0001>
module attributes {stable_mosaic.version = 11 : i64} {
  func.func @_mlp_noacc_kernel(%arg0: i32, %arg1: memref<8x32xf32, #tpu.memory_space<vmem>>, %arg2: memref<64x32xf32, #tpu.memory_space<vmem>>, %arg3: memref<1x64xf32, #tpu.memory_space<vmem>>, %arg4: memref<8x64xf32, #tpu.memory_space<vmem>>) attributes {dimension_semantics = [#tpu.dimension_semantics<parallel>], iteration_bounds = array<i64: 2>, scalar_prefetch = 0 : i64, scratch_operands = 0 : i64, tpu.core_type = #tpu.core_type<tc>, window_params = [{transform_indices = @transform_0, window_bounds = array<i64: 8, 32>}, {pipeline_mode = #tpu.pipeline_mode<synchronous>, transform_indices = @transform_1, window_bounds = array<i64: 64, 32>}, {pipeline_mode = #tpu.pipeline_mode<synchronous>, transform_indices = @transform_2, window_bounds = array<i64: 1, 64>}, {transform_indices = @transform_3, window_bounds = array<i64: 8, 64>}]} {
    %c0 = arith.constant 0 : index
    %c0_0 = arith.constant 0 : index
    %0 = vector.load %arg1[%c0, %c0_0] : memref<8x32xf32, #tpu.memory_space<vmem>>, vector<8x32xf32>
    %c0_1 = arith.constant 0 : index
    %c0_2 = arith.constant 0 : index
    %1 = vector.load %arg2[%c0_1, %c0_2] : memref<64x32xf32, #tpu.memory_space<vmem>>, vector<64x32xf32>
    %cst = arith.constant dense<0.000000e+00> : vector<8x64xf32>
    %2 = tpu.matmul %0, %1, %cst {dimension_numbers = #tpu.dot_dimension_numbers<[1], [1], [0], [0], [0, 0, 1, 0], [], []>, precision = #tpu.contract_precision<fp32>} : vector<8x32xf32>, vector<64x32xf32>, vector<8x64xf32> -> vector<8x64xf32>
    %c0_3 = arith.constant 0 : index
    %c0_4 = arith.constant 0 : index
    %3 = vector.load %arg3[%c0_3, %c0_4] : memref<1x64xf32, #tpu.memory_space<vmem>>, vector<1x64xf32>
    %4 = vector.broadcast %3 : vector<1x64xf32> to vector<8x64xf32>
    %5 = arith.addf %2, %4 : vector<8x64xf32>
    %c0_5 = arith.constant 0 : index
    %c0_6 = arith.constant 0 : index
    %6 = vector.load %arg4[%c0_5, %c0_6] : memref<8x64xf32, #tpu.memory_space<vmem>>, vector<8x64xf32>
    tpu.vector_store %arg4[%c0_5, %c0_6], %5 {strides = array<i32>} : memref<8x64xf32, #tpu.memory_space<vmem>>, vector<8x64xf32>,
    return
  }
  func.func @transform_0(%arg0: i32) -> (i32, i32) {
    %c0_i32 = arith.constant 0 : i32
    %c0_i32_0 = arith.constant 0 : i32
    return %arg0, %c0_i32 : i32, i32
  }
  func.func @transform_1(%arg0: i32) -> (i32, i32) {
    %c0_i32 = arith.constant 0 : i32
    %c0_i32_0 = arith.constant 0 : i32
    %c0_i32_1 = arith.constant 0 : i32
    return %c0_i32, %c0_i32_0 : i32, i32
  }
  func.func @transform_2(%arg0: i32) -> (i32, i32) {
    %c0_i32 = arith.constant 0 : i32
    %c0_i32_0 = arith.constant 0 : i32
    %c0_i32_1 = arith.constant 0 : i32
    return %c0_i32, %c0_i32_0 : i32, i32
  }
  func.func @transform_3(%arg0: i32) -> (i32, i32) {
    %c0_i32 = arith.constant 0 : i32
    %c0_i32_0 = arith.constant 0 : i32
    return %arg0, %c0_i32 : i32, i32
  }
}

</mosaic_0001>

<bundles_post_ra>
// kernel: tpu_custom_call.1
= control target key start
LH: loop header
LB: loop body
LE: loop exit
PB: predicated region body
PF: predicated region fallthrough
CT: control target
= control target key end

     0   :  { %8 = vsyncpa [#allocation3], 0  ;;  %s1446_s0 = inlined_call_operand.vmem [shape: f32[16,32], index: 0, kind: input, shape index: {}]   ;;  %s1447_s1 = inlined_call_operand.vmem [shape: f32[64,32], index: 1, kind: input, shape index: {}]   ;;  %s1448_s2 = inlined_call_operand.vmem [shape: f32[1,64], index: 2, kind: input, shape index: {}]   ;;  %s1449_s3 = inlined_call_operand.hbm [shape: f32[16,64], index: 3, kind: output, shape index: {}]  }
   0x1   :  { %10 = vsyncpa [#allocation3 + $0x1], 0  ;;  %s1213_s12 = smov 0   ;;  %s1215_s13 = smov 0  }
   0x2   :  { %s1217_s14 = smov 0   ;;  %s1219_s15 = smov 0  }
   0x3 LB: > { %s1234_s16 = sadd.s32 4294967295, %s1187_s15   ;;  %s822_s17 = sadd.s32 4294967294, %s1187_s15   ;;  %s1187_s15 = sphi %s1219_s15, %s1455_s15   ;;  %s1183_s14 = sphi %s1217_s14, %s1454_s14   ;;  %s1179_s13 = sphi %s1215_s13, %s1453_s13   ;;  %s1175_s12 = sphi %s1213_s12, %s1452_s12  }
   0x4   : > { %s1238_s18 = sadd.s32 1, %s1187_s15   ;;  %s91_s19 = sadd.s32 1, %s1183_s14 }
   0x5   : > { %s88_s20 = ssub.s32 %s1187_s15, %s1238_s18  ;;  %p101_p0 = scmp.ne.s32.totalorder %s1183_s14, %s1179_s13 }
   0x6   : > { %p89_p1 = scmp.eq.s32.totalorder %s88_s20, 0  ;;  %p102_p2 = scmp.eq.s32.totalorder %s1234_s16, 1 }
   0x7   : > { %p107_p3 = scmp.ne.s32.totalorder %s1179_s13, %s1175_s12  ;;  %p108_p4 = scmp.eq.s32.totalorder %s822_s17, 1 }
   0x8   : > { %s1249_s21 = scalar_select %p89_p1, %s1183_s14, %s91_s19  }
   0x9   : > { %p1251_p5 = por %p102_p2, %p101_p0  ;;  %p1255_p6 = por %p108_p4, %p107_p3 }
   0xa   : > { %p825_p7 = scmp.ge.s32.totalorder %s1187_s15, 1  ;;  %p139_p8 = scmp.lt.s32.totalorder %s1187_s15, 3 }
   0xc   : > { %p140_p9 = pnand %p825_p7, %p139_p8 }
   0xd   : > { %v167_v0 = vld [vmem:[%s1447_s1] sm:$0xff] (!%p140_p9)  ;;  %v168_v1 = vld [vmem:[%s1447_s1 + $0x8] sm:$0xff] (!%p140_p9)  ;;  %vm182_vm0 = vcmask (!%p140_p9), 261120   ;;  %v169_v2 = vld [vmem:[%s1447_s1 + $0x10] sm:$0xff] (!%p140_p9)  ;;  %v1189_v3 = vmov (!%p140_p9), 0.0|0.0   ;;  %p162_p10 = scmp.lt.s32.totalorder (!%p140_p9), %s1234_s16, 1 }
   0xe   : > { %143 = sbr.rel (%p140_p9) target bundleno = 344 (0x158), region = 32  ;;  %1001 = vmatprep.subr.bf16.mxu1 (!%p140_p9), %v1189_v3  ;;  %1037 = vmatprep.subr.bf16.mxu0 (!%p140_p9), %v1189_v3  ;;  %v187_v4 = vsel (!%p140_p9), %vm182_vm0, %v167_v0, 0  ;;  %v190_v5 = vsel (!%p140_p9), %vm182_vm0, %v168_v1, 0  ;;  %v170_v6 = vld [vmem:[%s1447_s1 + $0x18] sm:$0xff] (!%p140_p9)  ;;  %v193_v9 = vsel (!%p140_p9), %vm182_vm0, %v169_v2, 0  ;;  %v171_v14 = vld [vmem:[%s1447_s1 + $0x20] sm:$0xff] (!%p140_p9) }
   0xf   : > { %v211_v7 = vand.u32 (!%p140_p9), 4294901760, %v187_v4  ;;  %v214_v8 = vand.u32 (!%p140_p9), 4294901760, %v190_v5  ;;  %v196_v10 = vsel (!%p140_p9), %vm182_vm0, %v170_v6, 0  ;;  %v217_v12 = vand.u32 (!%p140_p9), 4294901760, %v193_v9  ;;  %v172_v15 = vld [vmem:[%s1447_s1 + $0x28] sm:$0xff] (!%p140_p9)  ;;  %v173_v24 = vld [vmem:[%s1447_s1 + $0x30] sm:$0xff] (!%p140_p9) }
  0x10   : > { %v220_v13 = vand.u32 (!%p140_p9), 4294901760, %v196_v10  ;;  %vm1190_vm1 = vmmov (!%p140_p9), 0   ;;  %v1191_v16 = vmov (!%p140_p9), 0.0   ;;  %v199_v18 = vsel (!%p140_p9), %vm182_vm0, %v171_v14, 0  ;;  %v174_v25 = vld [vmem:[%s1447_s1 + $0x38] sm:$0xff] (!%p140_p9)  ;;  %s159_s27 = sand.u32 (!%p140_p9), 1, %s1179_s13  }
  0x11   : > { %v1280_v11 = vpack.c.bf16 (!%p140_p9), %v214_v8, %v211_v7  ;;  %903 = vmatprep.mubr.msk.f32.mxu1 (!%p140_p9), %vm1190_vm1, %v1191_v16  ;;  %960 = vmatprep.mubr.msk.f32.mxu0 (!%p140_p9), %vm1190_vm1, %v1191_v16  ;;  %v202_v19 = vsel (!%p140_p9), %vm182_vm0, %v172_v15, 0  ;;  %v223_v21 = vand.u32 (!%p140_p9), 4294901760, %v199_v18  ;;  %v1317_v27 = vsub.f32 (!%p140_p9), %v187_v4, %v211_v7  ;;  %s826_s28 = sshll.u32 (!%p140_p9), %s159_s27, 3  ;;  %s830_s4 = sshll.u32 (!%p140_p9), %s1234_s16, 7 }
  0x12   : > { %v1300_v17 = vpack.c.bf16 (!%p140_p9), %v220_v13, %v217_v12  ;;  %v226_v22 = vand.u32 (!%p140_p9), 4294901760, %v202_v19  ;;  %v1319_v28 = vsub.f32 (!%p140_p9), %v190_v5, %v214_v8  ;;  %v205_v30 = vsel (!%p140_p9), %vm182_vm0, %v173_v24, 0  ;;  %s1404_s9 = scalar_lea.hbm (!%p140_p9), %s1449_s3, %s830_s4  ;;  %s750_s10 = scalar_lea.sflag (!%p140_p9), [#allocation3], %s159_s27 }
  0x13   : > { %1003 = vmatpush3.bf16.xpose.msra.mxu1 (!%p140_p9), %v1280_v11  ;;  %1039 = vmatpush3.bf16.xpose.msra.mxu0 (!%p140_p9), %v1280_v11  ;;  %v208_v31 = vsel (!%p140_p9), %vm182_vm0, %v174_v25, 0  ;;  %v229_v33 = vand.u32 (!%p140_p9), 4294901760, %v205_v30  ;;  %v296_v35 = vand.u32 (!%p140_p9), 4294901760, %v1317_v27  ;;  %v1334_v37 = vsub.f32 (!%p140_p9), %v193_v9, %v217_v12  ;;  %s1192_s11 = smov (!%p140_p9), [#allocation2]  }
  0x14   : > { %1004 = vmatprep.subr.bf16.mxu1 (!%p140_p9), %v1189_v3  ;;  %1040 = vmatprep.subr.bf16.mxu0 (!%p140_p9), %v1189_v3  ;;  %v1321_v29 = vpack.c.bf16 (!%p140_p9), %v226_v22, %v223_v21  ;;  %v232_v34 = vand.u32 (!%p140_p9), 4294901760, %v208_v31  ;;  %v303_v36 = vand.u32 (!%p140_p9), 4294901760, %v1319_v28  ;;  %v1337_v39 = vsub.f32 (!%p140_p9), %v196_v10, %v220_v13  ;;  %s1129_s17 = sshll.u32 (!%p140_p9), %s1192_s11, 4  ;;  %s1130_s17 = int_to_ptr.vmem [resolvable:$false] %s1129_s17 }
  0x15   : > { %s163_s5 = scalar_select %p162_p10, %s1234_s16, 1  ;;  %v297_v41 = vsub.f32 %v1317_v27, %v296_v35  ;;  %v310_v46 = vand.u32 4294901760, %v1334_v37  ;;  %v1350_v48 = vsub.f32 %v199_v18, %v223_v21  ;;  %v1352_v49 = vsub.f32 %v202_v19, %v226_v22 }
  0x16   : > { %v1339_v40 = vpack.c.bf16 %v232_v34, %v229_v33  ;;  %v304_v42 = vsub.f32 %v1319_v28, %v303_v36  ;;  %v317_v47 = vand.u32 4294901760, %v1337_v39  ;;  %v1050_v52 = vpack.c.bf16 %v303_v36, %v296_v35 }
  0x17   : > { %s827_s6 = sshll.u32 %s163_s5, 3  ;;  %v298_v44 = vand.u32 4294901760, %v297_v41  ;;  %v311_v53 = vsub.f32 %v1334_v37, %v310_v46  ;;  %v324_v57 = vand.u32 4294901760, %v1350_v48  ;;  %v331_v58 = vand.u32 4294901760, %v1352_v49  ;;  %s161_s5 = scalar_lea.vmem [#allocation2], %s826_s28 }
  0x18   : > { %s165_s19 = scalar_lea.vmem %s1446_s0, %s827_s6  ;;  %v305_v45 = vand.u32 4294901760, %v304_v42  ;;  %v318_v54 = vsub.f32 %v1337_v39, %v317_v47  ;;  %v337_v59 = vsub.f32 %v205_v30, %v229_v33  ;;  %v344_v60 = vsub.f32 %v208_v31, %v232_v34  ;;  %s763_s6 = sshll.u32 %s161_s5, 4  ;;  %s1406_s6 = int_to_ptr.vmem [resolvable:$true] %s763_s6 }
  0x19   : > { %v166_v20 = vld [vmem:[%s165_s19] sm:$0xff]  ;;  %v312_v55 = vand.u32 4294901760, %v311_v53  ;;  %v1053_v62 = vpack.c.bf16 %v317_v47, %v310_v46  ;;  %v325_v63 = vsub.f32 %v1350_v48, %v324_v57  ;;  %v332_v0 = vsub.f32 %v1352_v49, %v331_v58  ;;  %s1125_s16 = scalar_lea.vmem %s1406_s6, 128  ;;  %s1131_s19 = scalar_lea.vmem %s1130_s17, 256 }
  0x1a   : > { %v184_v23 = vsel %vm182_vm0, %v166_v20, 0  ;;  %v1014_v51 = vpack.c.bf16 %v305_v45, %v298_v44  ;;  %v319_v56 = vand.u32 4294901760, %v318_v54  ;;  %v338_v4 = vand.u32 4294901760, %v337_v59  ;;  %p1126_p11 = scmp.ne.s32.totalorder %s1406_s6, %s1125_s16  ;;  %p1132_p0 = scmp.lt.s32.totalorder %s1406_s6, %s1130_s17 }
  0x1b   : > { %1006 = vmatpush3.bf16.xpose.msra.mxu1 %v1300_v17  ;;  %1042 = vmatpush3.bf16.xpose.msra.mxu0 %v1300_v17  ;;  %v1315_v26 = vand.u32 4294901760, %v184_v23  ;;  %v326_v1 = vand.u32 4294901760, %v325_v63  ;;  %v333_v2 = vand.u32 4294901760, %v332_v0  ;;  %v345_v5 = vand.u32 4294901760, %v344_v60  ;;  %p1133_p1 = scmp.lt.s32.totalorder %s1131_s19, %s1125_s16 }
  0x1c   : > { %1007 = vmatprep.subr.bf16.mxu1 %v1189_v3  ;;  %1043 = vmatprep.subr.bf16.mxu0 %v1189_v3  ;;  %v1017_v61 = vpack.c.bf16 %v319_v56, %v312_v55  ;;  %v1056_v7 = vpack.c.bf16 %v331_v58, %v324_v57  ;;  %v339_v8 = vsub.f32 %v337_v59, %v338_v4  ;;  %vm747_vm2 = vcmask 523264   ;;  %p1127_p12 = pnand %p1126_p11, %p1251_p5 }
  0x1d   : > { %v1326_v32 = vsub.f32 %v184_v23, %v1315_v26  ;;  %v1020_v6 = vpack.c.bf16 %v333_v2, %v326_v1  ;;  %v346_v9 = vsub.f32 %v344_v60, %v345_v5  ;;  %v1059_v14 = vpack.c.bf16 %v345_v5, %v338_v4  ;;  %p1134_p2 = por %p1133_p1, %p1132_p0 }
  0x1e   : > { %v340_v10 = vand.u32 4294901760, %v339_v8  ;;  %v1026_v15 = vpack.c.bf16 %v1319_v28, %v1317_v27  ;;  %v1029_v18 = vpack.c.bf16 %v1337_v39, %v1334_v37  ;;  %p1128_p13 = pneg %p1127_p12 }
  0x1f   : > { %v285_v38 = vand.u32 4294901760, %v1326_v32  ;;  %v347_v12 = vand.u32 4294901760, %v346_v9 }
  0x20   : > { %p1135_p3 = pnand %p1134_p2, %p1128_p13 }
  0x21   : > { %v286_v43 = vsub.f32 %v1326_v32, %v285_v38  ;;  %v1023_v13 = vpack.c.bf16 %v347_v12, %v340_v10 }
  0x23   : > { %1009 = vmatpush3.bf16.xpose.msra.mxu1 %v1321_v29  ;;  %1045 = vmatpush3.bf16.xpose.msra.mxu0 %v1321_v29  ;;  %v287_v50 = vand.u32 4294901760, %v286_v43 }
  0x24   : > { %1010 = vmatprep.subr.bf16.mxu1 %v1189_v3  ;;  %1046 = vmatprep.subr.bf16.mxu0 %v1189_v3 }
  0x2b   : > { %1012 = vmatpush3.bf16.xpose.msra.mxu1 %v1339_v40  ;;  %1048 = vmatpush3.bf16.xpose.msra.mxu0 %v1339_v40 }
  0x2c   : > { %1013 = vmatprep.subr.bf16.mxu1 %v1189_v3  ;;  %1049 = vmatprep.subr.bf16.mxu0 %v1189_v3 }
  0x32   : > { %904 = vmatmul.mubr.f32.vlgmr.msra.gmra.mrb[0].mxu1 %v287_v50  ;;  %961 = vmatmul.mubr.f32.vlgmr.msra.gmra.mrb[0].mxu0 %v285_v38 }
  0x33   : > { %1015 = vmatpush3.bf16.xpose.msra.mxu1 %v1014_v51  ;;  %1051 = vmatpush3.bf16.xpose.msra.mxu0 %v1050_v52 }
  0x34   : > { %1016 = vmatprep.subr.bf16.mxu1 %v1189_v3  ;;  %1052 = vmatprep.subr.bf16.mxu0 %v1189_v3 }
  0x35   : > { %922 = vmatprep.mubr.msk.f32.mxu1 %vm1190_vm1, %v1191_v16  ;;  %979 = vmatprep.mubr.msk.f32.mxu0 %vm1190_vm1, %v1191_v16 }
  0x3b   : > { %1018 = vmatpush3.bf16.xpose.msra.mxu1 %v1017_v61  ;;  %1054 = vmatpush3.bf16.xpose.msra.mxu0 %v1053_v62 }
  0x3c   : > { %1019 = vmatprep.subr.bf16.mxu1 %v1189_v3  ;;  %1055 = vmatprep.subr.bf16.mxu0 %v1189_v3 }
  0x43   : > { %1021 = vmatpush3.bf16.xpose.msra.mxu1 %v1020_v6  ;;  %1057 = vmatpush3.bf16.xpose.msra.mxu0 %v1056_v7 }
  0x44   : > { %1022 = vmatprep.subr.bf16.mxu1 %v1189_v3  ;;  %1058 = vmatprep.subr.bf16.mxu0 %v1189_v3 }
  0x4b   : > { %1024 = vmatpush3.bf16.xpose.msra.mxu1 %v1023_v13  ;;  %1060 = vmatpush3.bf16.xpose.msra.mxu0 %v1059_v14 }
  0x4c   : > { %1025 = vmatprep.subr.bf16.mxu1 %v1189_v3  ;;  %1061 = vmatprep.subr.bf16.mxu0 %v1189_v3 }
  0x52   : > { %923 = vmatmul.mubr.f32.vlgmr.msra.gmra.mrb[0].mxu1 %v1315_v26  ;;  %980 = vmatmul.mubr.f32.vlgmr.msra.gmra.mrb[0].mxu0 %v1315_v26 }
  0x53   : > { %1027 = vmatpush3.bf16.xpose.msra.mxu1 %v1026_v15  ;;  %1063 = vmatpush3.bf16.xpose.msra.mxu0 %v1280_v11  ;;  %v1032_v11 = vpack.c.bf16 %v1352_v49, %v1350_v48 }
  0x54   : > { %1028 = vmatprep.subr.bf16.mxu1 %v1189_v3  ;;  %1064 = vmatprep.subr.bf16.mxu0 %v1189_v3 }
  0x55   : > { %941 = vmatprep.mubr.msk.f32.mxu1 %vm1190_vm1, %v1191_v16  ;;  %998 = vmatprep.mubr.msk.f32.mxu0 %vm1190_vm1, %v1191_v16  ;;  %v1035_v16 = vpack.c.bf16 %v344_v60, %v337_v59 }
  0x5b   : > { %1030 = vmatpush3.bf16.xpose.msra.mxu1 %v1029_v18  ;;  %1066 = vmatpush3.bf16.xpose.msra.mxu0 %v1300_v17  ;;  %v828_v17 = vld [vmem:[%s1448_s2] ss:$0 sm:$0xff] }
  0x5c   : > { %1031 = vmatprep.subr.bf16.mxu1 %v1189_v3  ;;  %1067 = vmatprep.subr.bf16.mxu0 %v1189_v3 }
  0x63   : > { %1033 = vmatpush3.bf16.xpose.msra.mxu1 %v1032_v11  ;;  %1069 = vmatpush3.bf16.xpose.msra.mxu0 %v1321_v29 }
  0x64   : > { %1034 = vmatprep.subr.bf16.mxu1 %v1189_v3  ;;  %1070 = vmatprep.subr.bf16.mxu0 %v1189_v3 }
  0x6b   : > { %1036 = vmatpush3.bf16.xpose.msra.mxu1 %v1035_v16  ;;  %1072 = vmatpush3.bf16.xpose.msra.mxu0 %v1339_v40 }
  0x72   : > { %942 = vmatmul.mubr.f32.vlgmr.msra.gmra.mrb[0].mxu1 %v1326_v32  ;;  %999 = vmatmul.mubr.f32.vlgmr.msra.gmra.mrb[0].mxu0 %v1315_v26 }
 0x145   : > { %v488_v19 = vpop.f32.mrb[0].mxu1  ;;  %v743_v20 = vpop.f32.mrb[0].mxu0 }
 0x146   : > { %v1073_v3 = vadd.f32 %v828_v17, %v488_v19  ;;  %v943_v21 = vpop.f32.mrb[1].mxu1  ;;  %v1000_v22 = vpop.f32.mrb[1].mxu0 }
 0x148   : > { %v1074_v23 = vadd.f32 %v1073_v3, %v743_v20 }
 0x14a   : > { %748 = vst.msk [vmem:[%s161_s5] sm:$0xff] %vm747_vm2, %v1074_v23 }
 0x14b   : > { %1138 = shalt.err (!%p1135_p3)
}
 0x14c   : > { %s1139_s20 = scalar_lea.hbm %s1404_s9, 128  ;;  %s1143_s26 = scalar_lea.hbm %s1449_s3, 256 }
 0x14d   : > { %p1140_p4 = scmp.ne.s32.totalorder %s1404_s9, %s1139_s20  ;;  %p1144_p9 = scmp.lt.u32.totalorder %s1404_s9, %s1449_s3 }
 0x14e   : > { %p1145_p10 = scmp.lt.u32.totalorder %s1143_s26, %s1139_s20  ;;  %p1147_p12 = scmp.lt.u32.totalorder %s1139_s20, %s1404_s9 }
 0x14f   : > { %p1141_p7 = pnand %p1140_p4, %p1251_p5 }
 0x150   : > { %p1146_p11 = por %p1145_p10, %p1144_p9 }
 0x151   : > { %p1142_p8 = pneg %p1141_p7 }
 0x152   : > { %p1148_p13 = por %p1147_p12, %p1146_p11 }
 0x154   : > { %p1149_p0 = pnand %p1148_p13, %p1142_p8 }
 0x156   : > { %1152 = shalt.err (!%p1149_p0)
}
 0x157   : > { %1083 = dma.vmem_to_hbm [thread:$0]  (%p1251_p5), %s1406_s6, 128, %s1404_s9, %s750_s10  }
 0x158 PF: > { %p1089_p1 = scmp.ge.s32.totalorder %s1187_s15, 2  ;;  %s775_s29 = sand.u32 1, %s1175_s12  }
 0x159   : > { %s776_s30 = scalar_lea.sflag [#allocation3], %s775_s29 }
 0x15a   : > { %p1086_p2 = pnand %p1089_p1, %p1255_p6 }
 0x15c   : > { %1170 = dma.done.wait (!%p1086_p2), %s776_s30, 128  }
 0x15d   : > { %1172 = vsyncadd (!%p1086_p2), %s776_s30, 4294967168  ;;  %p13_p3 = scmp.ge.s32.totalorder %s1238_s18, 4   ;;  %s1452_s12 = smov %s1179_s13 }
 0x15e   : > { %s1453_s13 = smov %s1183_s14  ;;  %s1454_s14 = smov %s1249_s21 }
 0x15f   : > { %s1455_s15 = smov %s1238_s18  ;;  %15 = sbr.rel (!%p13_p3) target bundleno = 3 (0x3), region = 67 }
 0x166   :  { %781 = vsyncpa [#allocation3], 1 }
 0x167   :  { %783 = vsyncpa [#allocation3 + $0x1], 1 }

</bundles_post_ra>
